<compile_context>
chip_gen: v5e
topology: v5e:2x2
jax: 0.10.0
libtpu: 0.0.40
codegen_flags: <defaults>
</compile_context>

<pallas_src>
import functools
import math

import jax
import jax.numpy as jnp
import numpy as np
from jax.experimental import pallas as pl
from jax.experimental.pallas import tpu as pltpu


def _round_up(x, m):
    return ((x + m - 1) // m) * m


# ------------------------------ Pallas kernel -------------------------------

def _mlp_kernel(x_ref, w1_ref, b1_ref, w2_ref, b2_ref, o_ref):
    # Fused input cast: x arrives as f32 (read once from HBM), packed to bf16
    # here instead of a separate XLA cast+pad pass in the wrapper.
    x = x_ref[...].astype(w1_ref.dtype)
    # Layer 1: (TM, K) @ (K, H) on the MXU, f32 accumulation, fused bias+ReLU.
    h = jnp.dot(x, w1_ref[...], preferred_element_type=jnp.float32)
    h = jnp.maximum(h + b1_ref[...], 0.0)
    # Layer 2: (TM, H) @ (H, Np), f32 accumulation, fused bias.
    out = jnp.dot(h.astype(w2_ref.dtype), w2_ref[...],
                  preferred_element_type=jnp.float32)
    o_ref[...] = (out + b2_ref[...]).astype(o_ref.dtype)


# ----------------------------- M-tile selection ------------------------------

def _select_m_tiling(B, max_tm=512):
    """Return (tm, Mp): rows per grid step and padded M extent.

    Small B -> one full-extent block (no padding, legal even if B % 8 != 0).
    Large B -> tm ~= ceil(B / n_steps) rounded up to 8, keeping padding waste
    small; for B >= 256 we force >= 2 steps so v7x's two TensorCores both get
    work via dimension_semantics=("parallel",).
    """
    n_steps = max(1, -(-B // max_tm))
    if B >= 256:
        n_steps = max(n_steps, 2)
    if n_steps == 1:
        return B, B
    tm = _round_up(-(-B // n_steps), 8)
    return tm, tm * n_steps


# ------------------------------ Call wrapper --------------------------------

def mlp_forward(x, packed, n_out, *, out_dtype=jnp.float32, max_tm=512):
    """Fused MLP forward: fc2(relu(fc1(x))).

    x: (B, K) float32 (cast to bf16 inside the kernel).
    packed: dict of pre-padded, pre-cast params from pack_params() (built once
    at init time, NOT per call).
    """
    B, K = x.shape
    w1p, b1p, w2p, b2p = packed["w1"], packed["b1"], packed["w2"], packed["b2"]
    Kw, Hp = w1p.shape
    Hp2, Np = w2p.shape
    assert K == Kw and Hp == Hp2 and n_out <= Np

    tm, Mp = _select_m_tiling(B, max_tm)
    # Only the ragged large-batch case pays a (small) per-call M pad of x.
    xp = x if Mp == B else jnp.zeros((Mp, K), x.dtype).at[:B].set(x)

    grid = (Mp // tm,)
    flops = 2 * Mp * (K * Hp + Hp * Np)
    bytes_accessed = (xp.size * xp.dtype.itemsize
                      + (w1p.size + w2p.size) * w1p.dtype.itemsize
                      + (b1p.size + b2p.size) * 4
                      + Mp * Np * jnp.dtype(out_dtype).itemsize)

    out = pl.pallas_call(
        _mlp_kernel,
        out_shape=jax.ShapeDtypeStruct((Mp, Np), out_dtype),
        grid_spec=pltpu.PrefetchScalarGridSpec(
            num_scalar_prefetch=0,
            grid=grid,
            in_specs=[
                pl.BlockSpec((tm, K), lambda i: (i, 0)),    # x tile (pipelined)
                pl.BlockSpec((K, Hp), lambda i: (0, 0)),    # W1 (VMEM-resident)
                pl.BlockSpec((1, Hp), lambda i: (0, 0)),    # b1
                pl.BlockSpec((Hp, Np), lambda i: (0, 0)),   # W2 (VMEM-resident)
                pl.BlockSpec((1, Np), lambda i: (0, 0)),    # b2
            ],
            out_specs=pl.BlockSpec((tm, Np), lambda i: (i, 0)),
        ),
        compiler_params=pltpu.CompilerParams(
            dimension_semantics=("parallel",)),
        cost_estimate=pl.CostEstimate(
            flops=flops, transcendentals=0, bytes_accessed=bytes_accessed),
    )(xp, w1p, b1p, w2p, b2p)

    return out[:B, :n_out]


# ------------------------------- Parameters ---------------------------------

def _linear_init(key, fan_in, fan_out):
    # Matches torch.nn.Linear default init: U(-1/sqrt(fan_in), 1/sqrt(fan_in)).
    kw, kb = jax.random.split(key)
    bound = 1.0 / math.sqrt(fan_in)
    w = jax.random.uniform(kw, (fan_in, fan_out), jnp.float32, -bound, bound)
    b = jax.random.uniform(kb, (fan_out,), jnp.float32, -bound, bound)
    return w, b


def make_params(key, in_features, hidden, out_features):
    k1, k2 = jax.random.split(key)
    w1, b1 = _linear_init(k1, in_features, hidden)
    w2, b2 = _linear_init(k2, hidden, out_features)
    return {"w1": w1, "b1": b1, "w2": w2, "b2": b2}


def pack_params(params, compute_dtype=jnp.bfloat16):
    """One-time padding (lane-dense H/N) + bf16 cast of the kernel operands.

    Done ONCE at init so the per-forward path contains no pad/cast XLA ops.
    Zero padding keeps the math exact; the wrapper slices the extra classes off.
    """
    w1, b1, w2, b2 = params["w1"], params["b1"], params["w2"], params["b2"]
    K, H = w1.shape
    H2, N = w2.shape
    assert H == H2
    Hp = _round_up(H, 128)
    Np = _round_up(N, 128)          # lane-dense output tiles (no masked vst)
    w1p = jnp.zeros((K, Hp), compute_dtype).at[:, :H].set(w1.astype(compute_dtype))
    b1p = jnp.zeros((1, Hp), jnp.float32).at[0, :H].set(b1.astype(jnp.float32))
    w2p = jnp.zeros((Hp, Np), compute_dtype).at[:H, :N].set(w2.astype(compute_dtype))
    b2p = jnp.zeros((1, Np), jnp.float32).at[0, :N].set(b2.astype(jnp.float32))
    return {"w1": w1p, "b1": b1p, "w2": w2p, "b2": b2p}


# --------------------------- Pure-JAX reference -----------------------------

def _ref_forward(x, p):
    h = jnp.maximum(
        jnp.matmul(x, p["w1"], precision=jax.lax.Precision.HIGHEST) + p["b1"], 0.0)
    return jnp.matmul(h, p["w2"], precision=jax.lax.Precision.HIGHEST) + p["b2"]


# ---------------------------------- Main ------------------------------------

if __name__ == "__main__":
    # args: ws=16 (=> in_features = ws*3 = 48), type != 'metric', bs_classes=10.
    ws = 16
    bs_classes = 10
    in_features = ws * 3
    hidden = 512
    # TODO(synk): args.type == 'metric' only swaps out_features to args.out_dim;
    # the same kernel applies, only the non-metric branch is instantiated here.

    key = jax.random.PRNGKey(0)
    kp, kx1, kx2 = jax.random.split(key, 3)
    params = make_params(kp, in_features, hidden, bs_classes)
    packed = pack_params(params)        # pad + bf16-cast ONCE, not per forward

    fwd = jax.jit(functools.partial(mlp_forward, n_out=bs_classes))

    # Small demo batch: single full-extent block, zero padding, one grid step.
    x = jax.random.normal(kx1, (2, in_features), jnp.float32)
    out = jax.block_until_ready(fwd(x, packed))
    assert out.shape == (2, bs_classes)
    np.testing.assert_allclose(np.asarray(out), np.asarray(_ref_forward(x, params)),
                               rtol=5e-2, atol=5e-2)

    # Larger batch: exercises the adaptive-tm / padded-M / multi-step path
    # (B=300 -> 2 parallel grid steps of tm=152 rows).
    x2 = jax.random.normal(kx2, (300, in_features), jnp.float32)
    out2 = jax.block_until_ready(fwd(x2, packed))
    assert out2.shape == (300, bs_classes)
    np.testing.assert_allclose(np.asarray(out2), np.asarray(_ref_forward(x2, params)),
                               rtol=5e-2, atol=5e-2)

    print("KERNEL_OK")
</pallas_src>

<mosaic_0001>
module attributes {stable_mosaic.version = 11 : i64} {
  func.func @_mlp_kernel(%arg0: i32, %arg1: memref<2x48xf32, #tpu.memory_space<vmem>>, %arg2: memref<48x512xbf16, #tpu.memory_space<vmem>>, %arg3: memref<1x512xf32, #tpu.memory_space<vmem>>, %arg4: memref<512x128xbf16, #tpu.memory_space<vmem>>, %arg5: memref<1x128xf32, #tpu.memory_space<vmem>>, %arg6: memref<2x128xf32, #tpu.memory_space<vmem>>) attributes {dimension_semantics = [#tpu.dimension_semantics<parallel>], iteration_bounds = array<i64: 1>, scalar_prefetch = 0 : i64, scratch_operands = 0 : i64, tpu.core_type = #tpu.core_type<tc>, window_params = [{transform_indices = @transform_0, window_bounds = array<i64: 2, 48>}, {pipeline_mode = #tpu.pipeline_mode<synchronous>, transform_indices = @transform_1, window_bounds = array<i64: 48, 512>}, {pipeline_mode = #tpu.pipeline_mode<synchronous>, transform_indices = @transform_2, window_bounds = array<i64: 1, 512>}, {pipeline_mode = #tpu.pipeline_mode<synchronous>, transform_indices = @transform_3, window_bounds = array<i64: 512, 128>}, {pipeline_mode = #tpu.pipeline_mode<synchronous>, transform_indices = @transform_4, window_bounds = array<i64: 1, 128>}, {transform_indices = @transform_5, window_bounds = array<i64: 2, 128>}]} {
    %c0 = arith.constant 0 : index
    %c0_0 = arith.constant 0 : index
    %0 = vector.load %arg1[%c0, %c0_0] : memref<2x48xf32, #tpu.memory_space<vmem>>, vector<2x48xf32>
    %1 = arith.truncf %0 : vector<2x48xf32> to vector<2x48xbf16>
    %c0_1 = arith.constant 0 : index
    %c0_2 = arith.constant 0 : index
    %2 = vector.load %arg2[%c0_1, %c0_2] : memref<48x512xbf16, #tpu.memory_space<vmem>>, vector<48x512xbf16>
    %cst = arith.constant dense<0.000000e+00> : vector<2x512xf32>
    %3 = tpu.matmul %1, %2, %cst {dimension_numbers = #tpu.dot_dimension_numbers<[1], [0], [0], [1], [0, 0, 1, 1], [], []>} : vector<2x48xbf16>, vector<48x512xbf16>, vector<2x512xf32> -> vector<2x512xf32>
    %c0_3 = arith.constant 0 : index
    %c0_4 = arith.constant 0 : index
    %4 = vector.load %arg3[%c0_3, %c0_4] : memref<1x512xf32, #tpu.memory_space<vmem>>, vector<1x512xf32>
    %5 = vector.broadcast %4 : vector<1x512xf32> to vector<2x512xf32>
    %6 = arith.addf %3, %5 : vector<2x512xf32>
    %cst_5 = arith.constant 0.000000e+00 : f32
    %7 = vector.broadcast %cst_5 : f32 to vector<2x512xf32>
    %8 = arith.maximumf %6, %7 : vector<2x512xf32>
    %9 = arith.truncf %8 : vector<2x512xf32> to vector<2x512xbf16>
    %c0_6 = arith.constant 0 : index
    %c0_7 = arith.constant 0 : index
    %10 = vector.load %arg4[%c0_6, %c0_7] : memref<512x128xbf16, #tpu.memory_space<vmem>>, vector<512x128xbf16>
    %cst_8 = arith.constant dense<0.000000e+00> : vector<2x128xf32>
    %11 = tpu.matmul %9, %10, %cst_8 {dimension_numbers = #tpu.dot_dimension_numbers<[1], [0], [0], [1], [0, 0, 1, 1], [], []>} : vector<2x512xbf16>, vector<512x128xbf16>, vector<2x128xf32> -> vector<2x128xf32>
    %c0_9 = arith.constant 0 : index
    %c0_10 = arith.constant 0 : index
    %12 = vector.load %arg5[%c0_9, %c0_10] : memref<1x128xf32, #tpu.memory_space<vmem>>, vector<1x128xf32>
    %13 = vector.broadcast %12 : vector<1x128xf32> to vector<2x128xf32>
    %14 = arith.addf %11, %13 : vector<2x128xf32>
    %c0_11 = arith.constant 0 : index
    %c0_12 = arith.constant 0 : index
    %15 = vector.load %arg6[%c0_11, %c0_12] : memref<2x128xf32, #tpu.memory_space<vmem>>, vector<2x128xf32>
    tpu.vector_store %arg6[%c0_11, %c0_12], %14 {strides = array<i32>} : memref<2x128xf32, #tpu.memory_space<vmem>>, vector<2x128xf32>,
    return
  }
  func.func @transform_0(%arg0: i32) -> (i32, i32) {
    %c0_i32 = arith.constant 0 : i32
    %c0_i32_0 = arith.constant 0 : i32
    return %arg0, %c0_i32 : i32, i32
  }
  func.func @transform_1(%arg0: i32) -> (i32, i32) {
    %c0_i32 = arith.constant 0 : i32
    %c0_i32_0 = arith.constant 0 : i32
    %c0_i32_1 = arith.constant 0 : i32
    return %c0_i32, %c0_i32_0 : i32, i32
  }
  func.func @transform_2(%arg0: i32) -> (i32, i32) {
    %c0_i32 = arith.constant 0 : i32
    %c0_i32_0 = arith.constant 0 : i32
    %c0_i32_1 = arith.constant 0 : i32
    return %c0_i32, %c0_i32_0 : i32, i32
  }
  func.func @transform_3(%arg0: i32) -> (i32, i32) {
    %c0_i32 = arith.constant 0 : i32
    %c0_i32_0 = arith.constant 0 : i32
    %c0_i32_1 = arith.constant 0 : i32
    return %c0_i32, %c0_i32_0 : i32, i32
  }
  func.func @transform_4(%arg0: i32) -> (i32, i32) {
    %c0_i32 = arith.constant 0 : i32
    %c0_i32_0 = arith.constant 0 : i32
    %c0_i32_1 = arith.constant 0 : i32
    return %c0_i32, %c0_i32_0 : i32, i32
  }
  func.func @transform_5(%arg0: i32) -> (i32, i32) {
    %c0_i32 = arith.constant 0 : i32
    %c0_i32_0 = arith.constant 0 : i32
    return %arg0, %c0_i32 : i32, i32
  }
}

</mosaic_0001>

<bundles_post_ra>
// kernel: mlp_forward.1
= control target key start
LH: loop header
LB: loop body
LE: loop exit
PB: predicated region body
PF: predicated region fallthrough
CT: control target
= control target key end

     0   :  { %10 = vsyncpa [#allocation3], 0  ;;  %s980_s0 = inlined_call_operand.hbm [shape: f32[2,48], index: 0, kind: input, shape index: {}]   ;;  %s981_s1 = inlined_call_operand.hbm [shape: bf16[48,512], index: 1, kind: input, shape index: {}]   ;;  %s982_s2 = inlined_call_operand.hbm [shape: f32[1,512], index: 2, kind: input, shape index: {}]   ;;  %s983_s3 = inlined_call_operand.hbm [shape: bf16[512,128], index: 3, kind: input, shape index: {}]   ;;  %s984_s4 = inlined_call_operand.vmem [shape: f32[1,128], index: 4, kind: input, shape index: {}]   ;;  %s985_s5 = inlined_call_operand.hbm [shape: f32[2,128], index: 5, kind: output, shape index: {}]  }
   0x1   :  { %11 = vsyncpa [#allocation6], 0 }
   0x2   :  { %12 = vsyncpa [#allocation9], 0  ;;  %s29_s20 = sshll.u32 %s981_s1, 4  ;;  %s30_s20 = int_to_ptr.hbm [resolvable:$true] %s29_s20 }
   0x3   :  { %13 = vsyncpa [#allocation4], 0  ;;  %s923_s21 = smov [#allocation5]   ;;  %s19_s25 = sshll.u32 %s980_s0, 4  ;;  %s20_s25 = int_to_ptr.hbm [resolvable:$true] %s19_s25 }
   0x4   :  { %s31_s22 = sshll.u32 %s923_s21, 4  ;;  %s924_s26 = smov 256   ;;  %s32_s22 = int_to_ptr.vmem [resolvable:$true] %s31_s22 }
   0x5   :  { %s925_s27 = smov 16   ;;  %s926_s28 = smov [#allocation2]  }
   0x6   :  { %37 = dma.hbm_to_vmem [thread:$0]  %s30_s20, 1536, %s32_s22, [#allocation6], %s924_s26, %s924_s26, %s925_s27  }
   0x7   :  { %s21_s29 = sshll.u32 %s926_s28, 4  ;;  %s43_s7 = sshll.u32 %s982_s2, 4  ;;  %s22_s29 = int_to_ptr.vmem [resolvable:$true] %s21_s29  ;;  %s44_s7 = int_to_ptr.hbm [resolvable:$true] %s43_s7 }
   0x8   :  { %24 = dma.hbm_to_vmem [thread:$0]  %s20_s25, 32, %s22_s29, [#allocation3]  }
   0x9   :  { %s53_s9 = sshll.u32 %s983_s3, 4  ;;  %s927_s10 = smov [#allocation7]   ;;  %s54_s9 = int_to_ptr.hbm [resolvable:$true] %s53_s9 }
   0xa   :  { %s45_s11 = sshll.u32 %s927_s10, 4  ;;  %s928_s0 = smov [#allocation8]   ;;  %s46_s11 = int_to_ptr.vmem [resolvable:$true] %s45_s11 }
   0xb   :  { %48 = dma.hbm_to_vmem [thread:$0]  %s44_s7, 64, %s46_s11, [#allocation6]  }
   0xc   :  { %s55_s12 = sshll.u32 %s928_s0, 4  ;;  %s929_s13 = smov 64   ;;  %s56_s12 = int_to_ptr.vmem [resolvable:$true] %s55_s12 }
   0xd   :  { %s930_s14 = smov 4  }
   0xe   :  { %61 = dma.hbm_to_vmem [thread:$0]  %s54_s9, 4096, %s56_s12, [#allocation9], %s929_s13, %s929_s13, %s930_s14  }
   0xf   :  { %915 = dma.done.wait [#allocation3], 32  }
  0x10   :  { %916 = vsyncadd [#allocation3], 4294967264 }
  0x11   :  { %917 = dma.done.wait [#allocation6], 1600  }
  0x12   :  { %918 = vsyncadd [#allocation6], 4294965696 }
  0x13   :  { %919 = dma.done.wait [#allocation9], 4096  }
  0x14   :  { %920 = vsyncadd [#allocation9], 4294963200  ;;  %v603_v0 = vld [vmem:[#allocation5 + $0x48] sm:$0xf]  ;;  %v752_v1 = vld [vmem:[#allocation5 + $0x54] sm:$0xf0] }
  0x15   :  { %v750_v2 = vld [vmem:[#allocation5 + $0x4c] sm:$0xf]  ;;  %v604_v3 = vor.u32 %v752_v1, %v603_v0  ;;  %v605_v4 = vld [vmem:[#allocation5 + $0x58] sm:$0xf0]  ;;  %v595_v5 = vld [vmem:[#allocation5 + $0x40] sm:$0xf] }
  0x16   :  { %v751_v6 = vld [vmem:[#allocation5 + $0x4c] sm:$0xf0]  ;;  %v608_v7 = vor.u32 %v750_v2, %v605_v4  ;;  %v749_v9 = vld [vmem:[#allocation5 + $0x44] sm:$0xf]  ;;  %v597_v10 = vld [vmem:[#allocation5 + $0x50] sm:$0xf0] }
  0x17   :  { %v596_v8 = vor.u32 %v751_v6, %v595_v5  ;;  %v587_v11 = vld [vmem:[#allocation5 + $0x28] sm:$0xf]  ;;  %200 = vmatpush.bf16.msra.mxu2 %v604_v3  ;;  %v600_v12 = vor.u32 %v749_v9, %v597_v10  ;;  %v748_v13 = vld [vmem:[#allocation5 + $0x34] sm:$0xf0]  ;;  %v746_v14 = vld [vmem:[#allocation5 + $0x2c] sm:$0xf] }
  0x18   :  { %v589_v15 = vld [vmem:[#allocation5 + $0x38] sm:$0xf0]  ;;  %213 = vmatpush.bf16.msra.mxu3 %v608_v7  ;;  %v588_v16 = vor.u32 %v748_v13, %v587_v11  ;;  %v579_v18 = vld [vmem:[#allocation5 + $0x20] sm:$0xf]  ;;  %v747_v19 = vld [vmem:[#allocation5 + $0x2c] sm:$0xf0] }
  0x19   :  { %174 = vmatpush.bf16.msra.mxu0 %v596_v8  ;;  %v592_v17 = vor.u32 %v746_v14, %v589_v15  ;;  %v745_v20 = vld [vmem:[#allocation5 + $0x24] sm:$0xf]  ;;  %187 = vmatpush.bf16.msra.mxu1 %v600_v12  ;;  %v580_v21 = vor.u32 %v747_v19, %v579_v18  ;;  %v581_v22 = vld [vmem:[#allocation5 + $0x30] sm:$0xf0]  ;;  %v571_v23 = vld [vmem:[#allocation5 + $0x8] sm:$0xf] }
  0x1a   :  { %v744_v24 = vld [vmem:[#allocation5 + $0x14] sm:$0xf0]  ;;  %v584_v25 = vor.u32 %v745_v20, %v581_v22  ;;  %v742_v26 = vld [vmem:[#allocation5 + $0xc] sm:$0xf]  ;;  %v573_v27 = vld [vmem:[#allocation5 + $0x18] sm:$0xf0] }
  0x1b   :  { %v563_v28 = vld [vmem:[#allocation5] sm:$0xf]  ;;  %201 = vmatpush.bf16.msra.mxu2 %v588_v16  ;;  %v572_v29 = vor.u32 %v744_v24, %v571_v23  ;;  %v743_v30 = vld [vmem:[#allocation5 + $0xc] sm:$0xf0]  ;;  %v81_v31 = vld [vmem:[#allocation2] sm:$0x3]  ;;  %v576_v33 = vor.u32 %v742_v26, %v573_v27 }
  0x1c   :  { %v741_v32 = vld [vmem:[#allocation5 + $0x4] sm:$0xf]  ;;  %214 = vmatpush.bf16.msra.mxu3 %v592_v17  ;;  %v564_v34 = vor.u32 %v743_v30, %v563_v28  ;;  %v565_v35 = vld [vmem:[#allocation5 + $0x10] sm:$0xf0]  ;;  %v760_v37 = vld [vmem:[#allocation8 + $0x38] sm:$0xff]  ;;  %v82_v38 = vpack.c.bf16 %v81_v31, %v81_v31  ;;  %vm165_vm0 = vcmask 392192  }
  0x1d   :  { %175 = vmatpush.bf16.msra.mxu0 %v580_v21  ;;  %188 = vmatpush.bf16.msra.mxu1 %v584_v25  ;;  %v568_v36 = vor.u32 %v741_v32, %v565_v35  ;;  %v768_v39 = vld [vmem:[#allocation8 + $0x78] sm:$0xff]  ;;  %v759_v41 = vld [vmem:[#allocation8 + $0x30] sm:$0xff]  ;;  %v758_v45 = vld [vmem:[#allocation8 + $0x28] sm:$0xff]  ;;  %s931_s15 = smov [#allocation10]   ;;  %s549_s19 = sshll.u32 %s985_s5, 4  ;;  %s550_s19 = int_to_ptr.hbm [resolvable:$true] %s549_s19 }
  0x1e   :  { %v776_v40 = vld [vmem:[#allocation8 + $0xb8] sm:$0xff]  ;;  %v767_v43 = vld [vmem:[#allocation8 + $0x70] sm:$0xff]  ;;  %v766_v47 = vld [vmem:[#allocation8 + $0x68] sm:$0xff]  ;;  %s547_s16 = sshll.u32 %s931_s15, 4  ;;  %s548_s16 = int_to_ptr.vmem [resolvable:$true] %s547_s16 }
  0x1f   :  { %202 = vmatpush.bf16.msra.mxu2 %v572_v29  ;;  %v784_v42 = vld [vmem:[#allocation8 + $0xf8] sm:$0xff]  ;;  %v775_v44 = vld [vmem:[#allocation8 + $0xb0] sm:$0xff]  ;;  %v774_v48 = vld [vmem:[#allocation8 + $0xa8] sm:$0xff] }
  0x20   :  { %215 = vmatpush.bf16.msra.mxu3 %v576_v33  ;;  %v783_v46 = vld [vmem:[#allocation8 + $0xf0] sm:$0xff]  ;;  %v757_v49 = vld [vmem:[#allocation8 + $0x20] sm:$0xff]  ;;  %v782_v50 = vld [vmem:[#allocation8 + $0xe8] sm:$0xff] }
  0x21   :  { %176 = vmatpush.bf16.msra.mxu0 %v564_v34  ;;  %189 = vmatpush.bf16.msra.mxu1 %v568_v36  ;;  %v765_v51 = vld [vmem:[#allocation8 + $0x60] sm:$0xff]  ;;  %v756_v53 = vld [vmem:[#allocation8 + $0x18] sm:$0xff]  ;;  %v755_v57 = vld [vmem:[#allocation8 + $0x10] sm:$0xff] }
  0x22   :  { %611 = vmatmul.msk.bf16.vlgmr.msra.gmra.mxu2 %vm165_vm0, %v82_v38  ;;  %v773_v52 = vld [vmem:[#allocation8 + $0xa0] sm:$0xff]  ;;  %v764_v55 = vld [vmem:[#allocation8 + $0x58] sm:$0xff]  ;;  %v763_v59 = vld [vmem:[#allocation8 + $0x50] sm:$0xff] }
  0x23   :  { %612 = vmatmul.msk.bf16.vlgmr.msra.gmra.mxu3 %vm165_vm0, %v82_v38  ;;  %515 = vmatpush.bf16.msrb.mxu2 %v776_v40  ;;  %v781_v54 = vld [vmem:[#allocation8 + $0xe0] sm:$0xff]  ;;  %v772_v56 = vld [vmem:[#allocation8 + $0x98] sm:$0xff]  ;;  %v754_v60 = vld [vmem:[#allocation8 + $0x8] sm:$0xff] }
  0x24   :  { %609 = vmatmul.msk.bf16.vlgmr.msra.gmra.mxu0 %vm165_vm0, %v82_v38  ;;  %610 = vmatmul.msk.bf16.vlgmr.msra.gmra.mxu1 %vm165_vm0, %v82_v38  ;;  %v780_v58 = vld [vmem:[#allocation8 + $0xd8] sm:$0xff]  ;;  %v771_v61 = vld [vmem:[#allocation8 + $0x90] sm:$0xff]  ;;  %v762_v63 = vld [vmem:[#allocation8 + $0x48] sm:$0xff] }
  0x25   :  { %489 = vmatpush.bf16.msrb.mxu0 %v760_v37  ;;  %502 = vmatpush.bf16.msrb.mxu1 %v768_v39  ;;  %v779_v62 = vld [vmem:[#allocation8 + $0xd0] sm:$0xff]  ;;  %v753_v0 = vld [vmem:[#allocation8] sm:$0xff]  ;;  %v770_v1 = vld [vmem:[#allocation8 + $0x88] sm:$0xff] }
  0x26   :  { %528 = vmatpush.bf16.msrb.mxu3 %v784_v42  ;;  %v778_v2 = vld [vmem:[#allocation8 + $0xc8] sm:$0xff]  ;;  %v761_v3 = vld [vmem:[#allocation8 + $0x40] sm:$0xff]  ;;  %v95_v6 = vld [vmem:[#allocation7] sm:$0xf] }
  0x27   :  { %516 = vmatpush.bf16.msrb.mxu2 %v775_v44  ;;  %v769_v4 = vld [vmem:[#allocation8 + $0x80] sm:$0xff]  ;;  %v97_v7 = vperm.slane %v95_v6, 0  ;;  %v98_v8 = vperm.slane %v95_v6, 1  ;;  %v99_v13 = vperm.slane %v95_v6, 2  ;;  %v100_v15 = vperm.slane %v95_v6, 3 }
  0x28   :  { %v777_v5 = vld [vmem:[#allocation8 + $0xc0] sm:$0xff]  ;;  %v794_v31 = vld [vmem:[%s984_s4] ss:$0 sm:$0xff] }
  0x29   :  { %490 = vmatpush.bf16.msrb.mxu0 %v759_v41  ;;  %503 = vmatpush.bf16.msrb.mxu1 %v767_v43 }
  0x2a   :  { %529 = vmatpush.bf16.msrb.mxu3 %v783_v46 }
  0x2b   :  { %517 = vmatpush.bf16.msrb.mxu2 %v774_v48 }
  0x2d   :  { %491 = vmatpush.bf16.msrb.mxu0 %v758_v45  ;;  %504 = vmatpush.bf16.msrb.mxu1 %v766_v47 }
  0x2e   :  { %530 = vmatpush.bf16.msrb.mxu3 %v782_v50 }
  0x2f   :  { %518 = vmatpush.bf16.msrb.mxu2 %v773_v52 }
  0x31   :  { %492 = vmatpush.bf16.msrb.mxu0 %v757_v49  ;;  %505 = vmatpush.bf16.msrb.mxu1 %v765_v51 }
  0x32   :  { %531 = vmatpush.bf16.msrb.mxu3 %v781_v54 }
  0x33   :  { %519 = vmatpush.bf16.msrb.mxu2 %v772_v56 }
  0x35   :  { %493 = vmatpush.bf16.msrb.mxu0 %v756_v53  ;;  %506 = vmatpush.bf16.msrb.mxu1 %v764_v55 }
  0x36   :  { %532 = vmatpush.bf16.msrb.mxu3 %v780_v58 }
  0x37   :  { %520 = vmatpush.bf16.msrb.mxu2 %v771_v61 }
  0x39   :  { %494 = vmatpush.bf16.msrb.mxu0 %v755_v57  ;;  %507 = vmatpush.bf16.msrb.mxu1 %v763_v59 }
  0x3a   :  { %533 = vmatpush.bf16.msrb.mxu3 %v779_v62 }
  0x3b   :  { %521 = vmatpush.bf16.msrb.mxu2 %v770_v1 }
  0x3d   :  { %495 = vmatpush.bf16.msrb.mxu0 %v754_v60  ;;  %508 = vmatpush.bf16.msrb.mxu1 %v762_v63 }
  0x3e   :  { %534 = vmatpush.bf16.msrb.mxu3 %v778_v2 }
  0x3f   :  { %522 = vmatpush.bf16.msrb.mxu2 %v769_v4 }
  0x41   :  { %496 = vmatpush.bf16.msrb.mxu0 %v753_v0  ;;  %509 = vmatpush.bf16.msrb.mxu1 %v761_v3 }
  0x42   :  { %535 = vmatpush.bf16.msrb.mxu3 %v777_v5 }
  0xa1   :  { %v178_v9 = vpop.f32.mrf.mxu0  ;;  %v191_v11 = vpop.f32.mrf.mxu1 }
  0xa2   :  { %v179_v10 = vadd.f32 %v178_v9, %v97_v7  ;;  %v192_v12 = vadd.f32 %v191_v11, %v98_v8 }
  0xa4   :  { %v221_v14 = vmax.f32 %v179_v10, 0.0  ;;  %v222_v16 = vmax.f32 %v192_v12, 0.0 }
  0xa5   :  { %v204_v18 = vpop.f32.mrf.mxu2 }
  0xa6   :  { %v225_v17 = vpack.c.bf16 %v221_v14, %v221_v14  ;;  %v226_v19 = vpack.c.bf16 %v222_v16, %v222_v16  ;;  %v205_v20 = vadd.f32 %v204_v18, %v99_v13  ;;  %v217_v21 = vpop.f32.mrf.mxu3 }
  0xa7   :  { %v218_v22 = vadd.f32 %v217_v21, %v100_v15 }
  0xa8   :  { %497 = vmatmul.bf16.vlgmr.msrb.gmra.mxu0 %v225_v17  ;;  %v223_v23 = vmax.f32 %v205_v20, 0.0  ;;  %510 = vmatmul.bf16.vlgmr.msrb.gmra.mxu1 %v226_v19 }
  0xa9   :  { %v180_v24 = vpop.f32.mrf.mxu0  ;;  %v224_v25 = vmax.f32 %v218_v22, 0.0  ;;  %v193_v26 = vpop.f32.mrf.mxu1 }
  0xaa   :  { %v227_v27 = vpack.c.bf16 %v223_v23, %v223_v23 }
  0xab   :  { %v228_v28 = vpack.c.bf16 %v224_v25, %v224_v25 }
  0xac   :  { %523 = vmatmul.bf16.vlgmr.msrb.gmra.mxu2 %v227_v27 }
  0xad   :  { %536 = vmatmul.bf16.vlgmr.msrb.gmra.mxu3 %v228_v28  ;;  %v206_v29 = vpop.f32.mrf.mxu2 }
  0xae   :  { %v219_v30 = vpop.f32.mrf.mxu3 }
 0x125   :  { %v498_v32 = vpop.f32.mrf.mxu0  ;;  %v511_v33 = vpop.f32.mrf.mxu1 }
 0x126   :  { %v499_v34 = vadd.f32 %v794_v31, %v498_v32 }
 0x128   :  { %v512_v35 = vadd.f32 %v511_v33, %v499_v34 }
 0x12d   :  { %v500_v36 = vpop.f32.mrf.mxu0  ;;  %v513_v37 = vpop.f32.mrf.mxu1 }
 0x12f   :  { %v524_v38 = vpop.f32.mrf.mxu2 }
 0x130   :  { %v525_v39 = vadd.f32 %v524_v38, %v512_v35  ;;  %v537_v40 = vpop.f32.mrf.mxu3 }
 0x132   :  { %v538_v41 = vadd.f32 %v537_v40, %v525_v39 }
 0x134   :  { %541 = vst [vmem:[#allocation10] sm:$0x3] %v538_v41 }
 0x135   :  { %552 = dma.vmem_to_hbm [thread:$0]  %s548_s16, 32, %s550_s19, [#allocation4]  }
 0x137   :  { %v526_v42 = vpop.f32.mrf.mxu2 }
 0x138   :  { %v539_v43 = vpop.f32.mrf.mxu3 }
 0x139   :  { %921 = dma.done.wait [#allocation4], 32  }
 0x13a   :  { %922 = vsyncadd [#allocation4], 4294967264 }
 0x13b   :  { %557 = vsyncpa [#allocation3], 1 }
 0x13c   :  { %558 = vsyncpa [#allocation6], 1 }
 0x13d   :  { %559 = vsyncpa [#allocation9], 1 }
 0x13e   :  { %560 = vsyncpa [#allocation4], 1 }

</bundles_post_ra>
